<compile_context>
chip_gen: v7x
topology: tpu7x:2x2x1
jax: 0.10.0
libtpu: 0.0.40
codegen_flags: <defaults>
</compile_context>

<pallas_src>
import functools

import numpy as np
import jax
import jax.numpy as jnp
from jax import lax
from jax.scipy.special import logsumexp
from jax.experimental import pallas as pl
from jax.experimental.pallas import tpu as pltpu


def _round_up(x, m):
    return (x + m - 1) // m * m


def _vmem_capacity_bytes():
    try:
        cap = getattr(pltpu.get_tpu_info(), "vmem_capacity_bytes", None)
        if cap:
            return int(cap)
    except Exception:
        pass
    return 128 * 1024 * 1024


# ----------------------------------------------------------------------------
# Single-buffering helper for blocks whose index_map is constant across the grid
# (the default double buffer is pure VMEM waste for them).  Falls back cleanly.
# ----------------------------------------------------------------------------
_SINGLE_BUFFER_OK = True


def _const_spec(block_shape, index_map):
    try:
        return pl.BlockSpec(block_shape, index_map, pipeline_mode=pl.Buffered(1))
    except Exception:
        return pl.BlockSpec(block_shape, index_map)


def _run_maybe_buffered(run):
    """run(use_buffered: bool) -> result.  Retries with default double-buffering
    if this Pallas build rejects pipeline_mode=pl.Buffered(1)."""
    global _SINGLE_BUFFER_OK
    if _SINGLE_BUFFER_OK:
        try:
            return run(True)
        except Exception:
            _SINGLE_BUFFER_OK = False
    return run(False)


# ----------------------------------------------------------------------------
# Pallas kernel 1: batched sentence-embedding projection (M, H) @ (H, D) -> (M, D)
# One call projects main + all candidate encodes at once; bf16 in/out, f32 accum.
# ----------------------------------------------------------------------------
def _linear_kernel(x_ref, w_ref, o_ref):
    o_ref[...] = jnp.dot(x_ref[...], w_ref[...],
                         preferred_element_type=jnp.float32).astype(o_ref.dtype)


def linear_embed(x_bf16, w_bf16):
    M, H = x_bf16.shape
    D = w_bf16.shape[1]
    # Memory-bound kernel: use the biggest row tile the data supports.
    if M >= 1024:
        TM = 512
    elif M >= 512:
        TM = 256
    elif M >= 128:
        TM = 128
    else:
        TM = _round_up(max(M, 1), 16)          # bf16 sublane packing
    M_pad = _round_up(M, TM)
    if M_pad != M:
        x_bf16 = jnp.pad(x_bf16, ((0, M_pad - M), (0, 0)))

    def run(use_buffered):
        w_spec = (_const_spec((H, D), lambda i: (0, 0)) if use_buffered
                  else pl.BlockSpec((H, D), lambda i: (0, 0)))
        return pl.pallas_call(
            _linear_kernel,
            grid=(M_pad // TM,),
            in_specs=[pl.BlockSpec((TM, H), lambda i: (i, 0)), w_spec],
            out_specs=pl.BlockSpec((TM, D), lambda i: (i, 0)),
            out_shape=jax.ShapeDtypeStruct((M_pad, D), jnp.bfloat16),
            compiler_params=pltpu.CompilerParams(
                dimension_semantics=("parallel",)),
        )(x_bf16, w_bf16)

    out = _run_maybe_buffered(run)
    return out[:M]


# ----------------------------------------------------------------------------
# Pallas kernel 2: one-shot candidate prep — L2 normalize rows, emit bf16.
# TODO(synk): fuse the (N_pad, D) -> (D, N_pad) transpose in here via an
# in-kernel XLU transpose to save one HBM pass (currently done by XLA).
# ----------------------------------------------------------------------------
def _cand_norm_kernel(c_ref, o_ref):
    c = c_ref[...].astype(jnp.float32)
    inv = lax.rsqrt(jnp.sum(c * c, axis=-1, keepdims=True) + jnp.float32(1e-12))
    o_ref[...] = (c * inv).astype(o_ref.dtype)


def normalize_candidates(cand_pad_bf16):
    N_pad, D = cand_pad_bf16.shape
    TN = 128
    return pl.pallas_call(
        _cand_norm_kernel,
        grid=(N_pad // TN,),
        in_specs=[pl.BlockSpec((TN, D), lambda i: (i, 0))],
        out_specs=pl.BlockSpec((TN, D), lambda i: (i, 0)),
        out_shape=jax.ShapeDtypeStruct((N_pad, D), jnp.bfloat16),
        compiler_params=pltpu.CompilerParams(
            dimension_semantics=("parallel",)),
    )(cand_pad_bf16)


# ----------------------------------------------------------------------------
# Pallas kernel 3: per-B-tile normalize(+scale) of main, bf16 MXU score matmul,
# and sum_log_nce_loss with a single stable softmax base.
#   main:  (BT, D)      bf16
#   candT: (D, N_pad)   bf16  (normalized, resident across B tiles)
#   mask:  (BT, N_pad)  int8  {-1: padded/invalid, 0: negative, 1: positive}
#   out:   (1, 8, 128)  f32   per-tile total loss, broadcast (lane-dense store)
# ----------------------------------------------------------------------------
def _alt_loss_kernel(main_ref, candT_ref, mask_ref, o_ref, *,
                     normalize, scale, single_pos):
    f32 = jnp.float32
    zero = f32(0.0)
    neg_inf = f32(-jnp.inf)

    main = main_ref[...].astype(f32)                                 # (BT, D)
    if normalize:
        inv = lax.rsqrt(jnp.sum(main * main, axis=-1, keepdims=True) + f32(1e-12))
        # fold `scale` into the (BT, D) operand instead of the (BT, N) scores
        main = main * (inv * f32(scale))

    scores = jnp.dot(main.astype(jnp.bfloat16), candT_ref[...],
                     preferred_element_type=f32)                     # (BT, N_pad)

    mk = mask_ref[...]                                               # int8
    pos = mk > 0
    valid = mk >= 0
    scores = jnp.where(valid, scores, neg_inf)                       # drop padding

    gold_sum = jnp.sum(jnp.where(pos, scores, zero), axis=-1, keepdims=True)
    npos = jnp.sum(jnp.where(pos, f32(1.0), zero), axis=-1, keepdims=True)

    # single stable softmax base over ALL valid scores in the row
    m_all = jnp.max(scores, axis=-1, keepdims=True)
    safe_m = jnp.where(m_all == neg_inf, zero, m_all)                # all-padded row
    e = jnp.exp(scores - safe_m)                                     # 0 at invalid
    e_pos_sum = jnp.sum(jnp.where(pos, e, zero), axis=-1, keepdims=True)
    # negatives = valid & not positive; padded lanes already contribute 0 to sum(e)
    z_neg = jnp.maximum(jnp.sum(e, axis=-1, keepdims=True) - e_pos_sum, zero)

    if single_pos:
        # <=1 positive per row: ONE log per row instead of one per score element.
        norm_term = safe_m + jnp.log(e_pos_sum + z_neg)
        row_loss = jnp.where(npos > zero, norm_term - gold_sum, zero)
    else:
        # general path (rows may have multiple positives)
        lae = safe_m + jnp.log(e + z_neg)
        norm_term = jnp.sum(jnp.where(pos, lae, zero), axis=-1, keepdims=True)
        row_loss = norm_term - gold_sum

    # per-tile scalar, stored as a lane-dense broadcast block (unmasked vst)
    tile_loss = jnp.sum(row_loss, axis=0, keepdims=True)             # (1, 1)
    o_ref[...] = jnp.broadcast_to(tile_loss[None], o_ref.shape)


def _choose_b_tile(B, vmem_cap):
    b32 = _round_up(max(B, 1), 32)
    if vmem_cap <= 80 * 1024 * 1024:
        # v7x-like: 64 MiB VMEM, 2 TensorCores -> smaller tiles, >= 2 grid steps
        if b32 <= 32:
            return 32
        return int(min(128, _round_up((b32 + 1) // 2, 32)))
    # v5e / v6e: 128 MiB VMEM, 1 TC -> bigger tiles amortize per-step overhead
    return int(min(256, b32))


def alt_loss_pallas(main_pad, candT_bf16, mask_pad_i8, *, b_tile, normalize,
                    scale, single_pos, vmem_cap):
    B_pad, D = main_pad.shape
    N_pad = candT_bf16.shape[1]
    BT = b_tile
    n_tiles = B_pad // BT

    # VMEM plan: double-buffered per-tile IO + (single-buffered) resident candT
    # + elementwise f32 temps.  Cap is generation aware (v7x has 64 MiB / TC).
    est = (2 * (BT * D * main_pad.dtype.itemsize + BT * N_pad * 1 + 8 * 128 * 4)
           + D * N_pad * 2
           + 6 * BT * N_pad * 4)
    budget = min(vmem_cap - 12 * 1024 * 1024, 100 * 1024 * 1024)
    vmem_limit = int(max(16 * 1024 * 1024, min(budget, 2 * est)))

    kernel = functools.partial(_alt_loss_kernel, normalize=normalize,
                               scale=scale, single_pos=single_pos)

    def run(use_buffered):
        candT_spec = (_const_spec((D, N_pad), lambda i: (0, 0)) if use_buffered
                      else pl.BlockSpec((D, N_pad), lambda i: (0, 0)))
        out = pl.pallas_call(
            kernel,
            grid=(n_tiles,),
            in_specs=[pl.BlockSpec((BT, D), lambda i: (i, 0)),
                      candT_spec,
                      pl.BlockSpec((BT, N_pad), lambda i: (i, 0))],
            out_specs=pl.BlockSpec((1, 8, 128), lambda i: (i, 0, 0)),
            out_shape=jax.ShapeDtypeStruct((n_tiles, 8, 128), jnp.float32),
            compiler_params=pltpu.CompilerParams(
                dimension_semantics=("parallel",),
                vmem_limit_bytes=vmem_limit),
        )(main_pad, candT_bf16, mask_pad_i8)
        return jnp.sum(out[:, 0, 0])

    return _run_maybe_buffered(run)


# ----------------------------------------------------------------------------
# AltLoss wrapper (mirrors the PyTorch module's forward)
# ----------------------------------------------------------------------------
class AltLoss:
    """JAX/Pallas port of AltLoss.forward.  The torch `model` sentence encoder is
    stood in by masked mean-pooling + a linear projection (weight given here)."""

    def __init__(self, embed_weight, normalize=True, scale=20.0):
        self.w_bf16 = jnp.asarray(embed_weight).astype(jnp.bfloat16)   # (H, D)
        self.normalize = normalize
        self.scale = float(scale)
        self._vmem_cap = _vmem_capacity_bytes()

    @staticmethod
    def _pool(features):
        tok = features["token_embeddings"].astype(jnp.float32)          # (B, T, H)
        am = features["attention_mask"].astype(jnp.float32)             # (B, T)
        return jnp.sum(tok * am[..., None], axis=1) / jnp.maximum(
            jnp.sum(am, axis=1, keepdims=True), 1e-9)                    # (B, H)

    def __call__(self, sentence_features, labels):
        B = sentence_features[0]["token_embeddings"].shape[0]
        C = len(sentence_features) - 1
        D = self.w_bf16.shape[1]

        # All C+1 encodes batched into ONE projection matmul (single launch).
        pooled_all = jnp.concatenate([self._pool(f) for f in sentence_features],
                                     axis=0).astype(jnp.bfloat16)        # ((C+1)B, H)
        emb_all = linear_embed(pooled_all, self.w_bf16)                  # ((C+1)B, D)
        main = emb_all[:B]                                               # (B, D) bf16

        # Candidate selection (output size depends on the concrete label values,
        # exactly like the torch loop -> host metadata + one sync).  Rows B..(C+1)B
        # of emb_all are already in (c, b) order, so gather directly with
        # flat_idx = c*B + b -- no (C,B,D)->(B,C,D) transpose.
        labels_np = np.asarray(labels)
        rows, cols = np.nonzero(labels_np >= 0)                          # row-major
        N = int(rows.shape[0])
        flat_idx = jnp.asarray(B + cols.astype(np.int32) * B + rows.astype(np.int32))
        candidates = jnp.take(emb_all, flat_idx, axis=0)                 # (N, D) bf16

        # Shape bucketing: retrace per power-of-two bucket of N, not per N.
        N_pad = max(128, int(pl.next_power_of_2(max(N, 1))))
        BT = _choose_b_tile(B, self._vmem_cap)
        B_pad = _round_up(B, BT)

        cand_pad = jnp.pad(candidates, ((0, N_pad - N), (0, 0)))
        if self.normalize:
            cand_pad = normalize_candidates(cand_pad)
        candT = jnp.transpose(cand_pad)                                  # (D, N_pad)

        main_pad = jnp.pad(main, ((0, B_pad - B), (0, 0)))

        # mask: -1 padded, 0 negative, 1 positive (only bool-ness matters in torch)
        mask_np = np.full((B_pad, N_pad), -1, dtype=np.int8)
        mask_np[:B, :N] = 0
        single_pos = True
        if N > 0:
            vals = labels_np[rows, cols]
            pos_flags = (vals > 0).astype(np.int8)
            mask_np[rows, np.arange(N)] = pos_flags
            single_pos = bool(np.bincount(rows, weights=pos_flags,
                                          minlength=B).max() <= 1)
        mask_pad = jnp.asarray(mask_np)

        return alt_loss_pallas(main_pad, candT, mask_pad, b_tile=BT,
                               normalize=self.normalize, scale=self.scale,
                               single_pos=single_pos, vmem_cap=self._vmem_cap)


# ----------------------------------------------------------------------------
# Pure-JAX f32 reference mirroring the torch module (for a loose sanity check).
# ----------------------------------------------------------------------------
def _reference_loss(sentence_features, labels, w, normalize, scale):
    w = jnp.asarray(w, jnp.float32)
    embs = [AltLoss._pool(f) @ w for f in sentence_features]
    main = embs[0]
    cand_stack = jnp.stack(embs[1:], axis=1)                            # (B, C, D)
    labels_np = np.asarray(labels)
    B, _ = labels_np.shape
    rows, cols = np.nonzero(labels_np >= 0)
    N = rows.shape[0]
    candidates = cand_stack[rows, cols, :]                              # (N, D)
    if normalize:
        candidates = candidates / jnp.linalg.norm(candidates, axis=1, keepdims=True)
        main = main / jnp.linalg.norm(main, axis=1, keepdims=True)
    scores = main @ candidates.T
    if normalize:
        scores = scores * scale
    mask_np = np.zeros((B, N), dtype=bool)
    mask_np[rows, np.arange(N)] = labels_np[rows, cols] > 0
    mask = jnp.asarray(mask_np)
    gold_sum = jnp.sum(jnp.where(mask, scores, 0.0), axis=-1)
    neg = jnp.where(mask, -jnp.inf, scores)
    neg_lse = logsumexp(neg, axis=-1, keepdims=True)
    norm_term = jnp.sum(jnp.where(mask, jnp.logaddexp(scores, neg_lse), 0.0), axis=-1)
    return -jnp.sum(gold_sum - norm_term)


if __name__ == "__main__":
    key = jax.random.PRNGKey(0)
    B, C, T, H, D = 2, 4, 8, 16, 32
    k_w, k_main, k_cand = jax.random.split(key, 3)

    w = jax.random.normal(k_w, (H, D), dtype=jnp.float32) * 0.1

    sentence_features = [{
        "token_embeddings": jax.random.normal(k_main, (B, T, H), dtype=jnp.float32),
        "attention_mask": jnp.ones((B, T), dtype=jnp.float32),
    }]
    for ck in jax.random.split(k_cand, C):
        sentence_features.append({
            "token_embeddings": jax.random.normal(ck, (B, T, H), dtype=jnp.float32),
            "attention_mask": jnp.ones((B, T), dtype=jnp.float32),
        })

    loss_fn = AltLoss(w, normalize=True, scale=20.0)

    # labels: negatives entries dropped, zero entries are negatives, positive
    # entries are positives.  First set has a multi-positive row (general path),
    # second set has <=1 positive per row (single-log fast path).
    labels_multi = jnp.array([[1, 0, -1, 1],
                              [0, 1, 1, -1]], dtype=jnp.int32)
    labels_single = jnp.array([[1, 0, -1, 0],
                               [0, -1, 1, 0]], dtype=jnp.int32)

    for labels in (labels_multi, labels_single):
        loss = jax.block_until_ready(loss_fn(sentence_features, labels))
        ref = jax.block_until_ready(
            _reference_loss(sentence_features, labels, w, True, 20.0))
        assert bool(jnp.isfinite(loss)), f"loss not finite: {loss}"
        assert abs(float(loss) - float(ref)) <= 2.0 + 0.3 * abs(float(ref)), \
            f"kernel loss {float(loss)} vs reference {float(ref)}"

    print("KERNEL_OK")
</pallas_src>

<mosaic_0001>
module attributes {stable_mosaic.version = 11 : i64} {
  func.func @_linear_kernel(%arg0: i32, %arg1: memref<16x16xbf16, #tpu.memory_space<vmem>>, %arg2: memref<16x32xbf16, #tpu.memory_space<vmem>>, %arg3: memref<16x32xbf16, #tpu.memory_space<vmem>>) attributes {dimension_semantics = [#tpu.dimension_semantics<parallel>], iteration_bounds = array<i64: 1>, scalar_prefetch = 0 : i64, scratch_operands = 0 : i64, tpu.core_type = #tpu.core_type<tc>, window_params = [{transform_indices = @transform_0, window_bounds = array<i64: 16, 16>}, {pipeline_mode = #tpu.pipeline_mode<synchronous>, transform_indices = @transform_1, window_bounds = array<i64: 16, 32>}, {transform_indices = @transform_2, window_bounds = array<i64: 16, 32>}]} {
    %c0 = arith.constant 0 : index
    %c0_0 = arith.constant 0 : index
    %0 = vector.load %arg1[%c0, %c0_0] : memref<16x16xbf16, #tpu.memory_space<vmem>>, vector<16x16xbf16>
    %c0_1 = arith.constant 0 : index
    %c0_2 = arith.constant 0 : index
    %1 = vector.load %arg2[%c0_1, %c0_2] : memref<16x32xbf16, #tpu.memory_space<vmem>>, vector<16x32xbf16>
    %cst = arith.constant dense<0.000000e+00> : vector<16x32xf32>
    %2 = tpu.matmul %0, %1, %cst {dimension_numbers = #tpu.dot_dimension_numbers<[1], [0], [0], [1], [0, 0, 1, 1], [], []>} : vector<16x16xbf16>, vector<16x32xbf16>, vector<16x32xf32> -> vector<16x32xf32>
    %3 = arith.truncf %2 : vector<16x32xf32> to vector<16x32xbf16>
    %c0_3 = arith.constant 0 : index
    %c0_4 = arith.constant 0 : index
    %4 = vector.load %arg3[%c0_3, %c0_4] : memref<16x32xbf16, #tpu.memory_space<vmem>>, vector<16x32xbf16>
    tpu.vector_store %arg3[%c0_3, %c0_4], %3 {strides = array<i32>} : memref<16x32xbf16, #tpu.memory_space<vmem>>, vector<16x32xbf16>,
    return
  }
  func.func @transform_0(%arg0: i32) -> (i32, i32) {
    %c0_i32 = arith.constant 0 : i32
    %c0_i32_0 = arith.constant 0 : i32
    return %arg0, %c0_i32 : i32, i32
  }
  func.func @transform_1(%arg0: i32) -> (i32, i32) {
    %c0_i32 = arith.constant 0 : i32
    %c0_i32_0 = arith.constant 0 : i32
    %c0_i32_1 = arith.constant 0 : i32
    return %c0_i32, %c0_i32_0 : i32, i32
  }
  func.func @transform_2(%arg0: i32) -> (i32, i32) {
    %c0_i32 = arith.constant 0 : i32
    %c0_i32_0 = arith.constant 0 : i32
    return %arg0, %c0_i32 : i32, i32
  }
}

module attributes {stable_mosaic.version = 11 : i64} {
  func.func @_linear_kernel(%arg0: i32, %arg1: memref<16x16xbf16, #tpu.memory_space<vmem>>, %arg2: memref<16x32xbf16, #tpu.memory_space<vmem>>, %arg3: memref<16x32xbf16, #tpu.memory_space<vmem>>) attributes {dimension_semantics = [#tpu.dimension_semantics<parallel>], iteration_bounds = array<i64: 1>, scalar_prefetch = 0 : i64, scratch_operands = 0 : i64, tpu.core_type = #tpu.core_type<tc>, window_params = [{transform_indices = @transform_0, window_bounds = array<i64: 16, 16>}, {pipeline_mode = #tpu.pipeline_mode<synchronous>, transform_indices = @transform_1, window_bounds = array<i64: 16, 32>}, {transform_indices = @transform_2, window_bounds = array<i64: 16, 32>}]} {
    %c0 = arith.constant 0 : index
    %c0_0 = arith.constant 0 : index
    %0 = vector.load %arg1[%c0, %c0_0] : memref<16x16xbf16, #tpu.memory_space<vmem>>, vector<16x16xbf16>
    %c0_1 = arith.constant 0 : index
    %c0_2 = arith.constant 0 : index
    %1 = vector.load %arg2[%c0_1, %c0_2] : memref<16x32xbf16, #tpu.memory_space<vmem>>, vector<16x32xbf16>
    %cst = arith.constant dense<0.000000e+00> : vector<16x32xf32>
    %2 = tpu.matmul %0, %1, %cst {dimension_numbers = #tpu.dot_dimension_numbers<[1], [0], [0], [1], [0, 0, 1, 1], [], []>} : vector<16x16xbf16>, vector<16x32xbf16>, vector<16x32xf32> -> vector<16x32xf32>
    %3 = arith.truncf %2 : vector<16x32xf32> to vector<16x32xbf16>
    %c0_3 = arith.constant 0 : index
    %c0_4 = arith.constant 0 : index
    %4 = vector.load %arg3[%c0_3, %c0_4] : memref<16x32xbf16, #tpu.memory_space<vmem>>, vector<16x32xbf16>
    tpu.vector_store %arg3[%c0_3, %c0_4], %3 {strides = array<i32>} : memref<16x32xbf16, #tpu.memory_space<vmem>>, vector<16x32xbf16>,
    return
  }
  func.func @transform_0(%arg0: i32) -> (i32, i32) {
    %c0_i32 = arith.constant 0 : i32
    %c0_i32_0 = arith.constant 0 : i32
    return %arg0, %c0_i32 : i32, i32
  }
  func.func @transform_1(%arg0: i32) -> (i32, i32) {
    %c0_i32 = arith.constant 0 : i32
    %c0_i32_0 = arith.constant 0 : i32
    %c0_i32_1 = arith.constant 0 : i32
    return %c0_i32, %c0_i32_0 : i32, i32
  }
  func.func @transform_2(%arg0: i32) -> (i32, i32) {
    %c0_i32 = arith.constant 0 : i32
    %c0_i32_0 = arith.constant 0 : i32
    return %arg0, %c0_i32 : i32, i32
  }
}

</mosaic_0001>

<bundles_post_ra>
// kernel: tpu_custom_call.1
= control target key start
LH: loop header
LB: loop body
LE: loop exit
PB: predicated region body
PF: predicated region fallthrough
CT: control target
= control target key end

     0   :  { %7 = vsyncpa [#allocation3], 0  ;;  %s293_s0 = inlined_call_operand.hbm [shape: bf16[16,16], index: 0, kind: input, shape index: {}]   ;;  %s294_s1 = inlined_call_operand.hbm [shape: bf16[16,32], index: 1, kind: input, shape index: {}]   ;;  %s295_s2 = inlined_call_operand.hbm [shape: bf16[16,32], index: 2, kind: output, shape index: {}]  }
   0x1   :  { %8 = vsyncpa [#allocation6], 0 }
   0x2   :  { %9 = vsyncpa [#allocation4], 0  ;;  %s226_s9 = smov [#allocation2]   ;;  %s154_s13 = scalar_lea.hbm %s293_s0, 128 }
   0x3   :  { %s15_s10 = sshll.u32 %s226_s9, 4  ;;  %p155_p0 = scmp.ne.s32.totalorder %s293_s0, %s154_s13  ;;  %s16_s10 = int_to_ptr.vmem [resolvable:$true] %s15_s10 }
   0x4   :  { %p158_p1 = scmp.lt.u32.totalorder %s154_s13, %s293_s0 }
   0x6   :  { %p160_p2 = pnand %p158_p1, %p155_p0 }
   0x8   :  { %163 = shalt.err (!%p160_p2)
}
   0x9   :  { %s164_s18 = scalar_lea.vmem %s16_s10, 128  ;;  %p169_p4 = scmp.lt.s32.totalorder %s16_s10, %s16_s10 }
   0xa   :  { %p165_p3 = scmp.ne.s32.totalorder %s16_s10, %s164_s18  ;;  %p170_p5 = scmp.lt.s32.totalorder %s164_s18, %s164_s18 }
   0xc   :  { %p171_p6 = por %p170_p5, %p169_p4 }
   0xe   :  { %p172_p7 = pnand %p171_p6, %p165_p3 }
  0x10   :  { %175 = shalt.err (!%p172_p7)
}
  0x11   :  { %s227_s19 = smov 64   ;;  %s228_s20 = smov 4  }
  0x12   :  { %21 = dma.hbm_to_vmem [thread:$0]  %s293_s0, 128, %s16_s10, [#allocation3], %s227_s19, %s227_s19, %s228_s20  }
  0x13   :  { %s229_s23 = smov [#allocation5]   ;;  %s176_s27 = scalar_lea.hbm %s294_s1, 128 }
  0x14   :  { %s27_s24 = sshll.u32 %s229_s23, 4  ;;  %p177_p8 = scmp.ne.s32.totalorder %s294_s1, %s176_s27  ;;  %s28_s24 = int_to_ptr.vmem [resolvable:$true] %s27_s24 }
  0x15   :  { %p180_p9 = scmp.lt.u32.totalorder %s176_s27, %s294_s1 }
  0x17   :  { %p182_p10 = pnand %p180_p9, %p177_p8 }
  0x19   :  { %185 = shalt.err (!%p182_p10)
}
  0x1a   :  { %s186_s4 = scalar_lea.vmem %s28_s24, 128  ;;  %p191_p12 = scmp.lt.s32.totalorder %s28_s24, %s28_s24 }
  0x1b   :  { %p187_p11 = scmp.ne.s32.totalorder %s28_s24, %s186_s4  ;;  %p192_p13 = scmp.lt.s32.totalorder %s186_s4, %s186_s4 }
  0x1d   :  { %p193_p0 = por %p192_p13, %p191_p12 }
  0x1f   :  { %p194_p1 = pnand %p193_p0, %p187_p11 }
  0x21   :  { %197 = shalt.err (!%p194_p1)
}
  0x22   :  { %33 = dma.hbm_to_vmem [thread:$0]  %s294_s1, 128, %s28_s24, [#allocation6], %s227_s19, %s227_s19, %s228_s20  }
  0x23   :  { %220 = dma.done.wait [#allocation3], 128  }
  0x24   :  { %221 = vsyncadd [#allocation3], 4294967168 }
  0x25   :  { %222 = dma.done.wait [#allocation6], 128  }
  0x26   :  { %223 = vsyncadd [#allocation6], 4294967168  ;;  %v230_v0 = vmov 0.0   ;;  %vm231_vm0 = vmmov 0   ;;  %v152_v1 = vld [vmem:[#allocation5] sm:$0xff]   ;;  %v153_v2 = vld [vmem:[#allocation2] sm:$0xff]  }
  0x27   :  { %139 = vmatprep.subr.bf16.mxu0 %v230_v0  ;;  %141 = vmatprep.mubr.msk.bf16.mxu0 %vm231_vm0, %v230_v0  ;;  %vm56_vm1 = vcmask 130048   ;;  %vm109_vm2 = vcmask 257024   ;;  %s232_s6 = smov [#allocation7]  }
  0x28   :  { %140 = vmatpush3.bf16.msra.mxu0 %v152_v1  ;;  %s117_s7 = sshll.u32 %s232_s6, 4  ;;  %s118_s7 = int_to_ptr.vmem [resolvable:$true] %s117_s7 }
  0x29   :  { %s198_s1 = scalar_lea.vmem %s118_s7, 128  ;;  %p203_p3 = scmp.lt.s32.totalorder %s118_s7, %s118_s7 }
  0x2a   :  { %p199_p2 = scmp.ne.s32.totalorder %s118_s7, %s198_s1  ;;  %p204_p4 = scmp.lt.s32.totalorder %s198_s1, %s198_s1 }
  0x2b   :  { %142 = vmatmul.mubr.msk.bf16.vlgmr.msra.gmra.mrb[0].mxu0 %vm56_vm1, %v153_v2 }
  0x2c   :  { %p205_p5 = por %p204_p4, %p203_p3 }
  0x2e   :  { %p206_p6 = pnand %p205_p5, %p199_p2 }
  0xfe   :  { %v94_v3 = vpop.f32.mrb[0].mxu0 }
  0xff   :  { %v135_v4 = vpack.c.bf16 %v94_v3, %v94_v3  ;;  %v143_v5 = vpop.f32.mrb[1].mxu0 }
 0x100   :  { %v97_v6 = vpop.f32.mrb[2].mxu0 }
 0x101   :  { %v136_v7 = vpack.c.bf16 %v97_v6, %v97_v6  ;;  %v144_v8 = vpop.f32.mrb[3].mxu0  ;;  %110 = vst.msk [vmem:[#allocation7] sm:$0xf] %vm109_vm2, %v135_v4 }
 0x103   :  { %111 = vst.msk [vmem:[#allocation7 + $0x4] sm:$0xf] %vm109_vm2, %v136_v7 }
 0x104   :  { %209 = shalt.err (!%p206_p6)
}
 0x105   :  { %s210_s10 = scalar_lea.hbm %s295_s2, 128 }
 0x106   :  { %p211_p7 = scmp.ne.s32.totalorder %s295_s2, %s210_s10  ;;  %p214_p8 = scmp.lt.u32.totalorder %s210_s10, %s295_s2 }
 0x108   :  { %p216_p9 = pnand %p214_p8, %p211_p7 }
 0x10a   :  { %219 = shalt.err (!%p216_p9)
}
 0x10b   :  { %123 = dma.vmem_to_hbm [thread:$0]  %s118_s7, 128, %s295_s2, [#allocation4], %s227_s19, %s227_s19, %s228_s20  }
 0x10c   :  { %224 = dma.done.wait [#allocation4], 128  }
 0x10d   :  { %225 = vsyncadd [#allocation4], 4294967168 }
 0x10e   :  { %127 = vsyncpa [#allocation3], 1 }
 0x10f   :  { %128 = vsyncpa [#allocation6], 1 }
 0x110   :  { %129 = vsyncpa [#allocation4], 1 }

// kernel: tpu_custom_call.1
= control target key start
LH: loop header
LB: loop body
LE: loop exit
PB: predicated region body
PF: predicated region fallthrough
CT: control target
= control target key end

     0   :  { %7 = vsyncpa [#allocation3], 0  ;;  %s293_s0 = inlined_call_operand.hbm [shape: bf16[16,16], index: 0, kind: input, shape index: {}]   ;;  %s294_s1 = inlined_call_operand.hbm [shape: bf16[16,32], index: 1, kind: input, shape index: {}]   ;;  %s295_s2 = inlined_call_operand.hbm [shape: bf16[16,32], index: 2, kind: output, shape index: {}]  }
   0x1   :  { %8 = vsyncpa [#allocation6], 0 }
   0x2   :  { %9 = vsyncpa [#allocation4], 0  ;;  %s226_s9 = smov [#allocation2]   ;;  %s154_s13 = scalar_lea.hbm %s293_s0, 128 }
   0x3   :  { %s15_s10 = sshll.u32 %s226_s9, 4  ;;  %p155_p0 = scmp.ne.s32.totalorder %s293_s0, %s154_s13  ;;  %s16_s10 = int_to_ptr.vmem [resolvable:$true] %s15_s10 }
   0x4   :  { %p158_p1 = scmp.lt.u32.totalorder %s154_s13, %s293_s0 }
   0x6   :  { %p160_p2 = pnand %p158_p1, %p155_p0 }
   0x8   :  { %163 = shalt.err (!%p160_p2)
}
   0x9   :  { %s164_s18 = scalar_lea.vmem %s16_s10, 128  ;;  %p169_p4 = scmp.lt.s32.totalorder %s16_s10, %s16_s10 }
   0xa   :  { %p165_p3 = scmp.ne.s32.totalorder %s16_s10, %s164_s18  ;;  %p170_p5 = scmp.lt.s32.totalorder %s164_s18, %s164_s18 }
   0xc   :  { %p171_p6 = por %p170_p5, %p169_p4 }
   0xe   :  { %p172_p7 = pnand %p171_p6, %p165_p3 }
  0x10   :  { %175 = shalt.err (!%p172_p7)
}
  0x11   :  { %s227_s19 = smov 64   ;;  %s228_s20 = smov 4  }
  0x12   :  { %21 = dma.hbm_to_vmem [thread:$0]  %s293_s0, 128, %s16_s10, [#allocation3], %s227_s19, %s227_s19, %s228_s20  }
  0x13   :  { %s229_s23 = smov [#allocation5]   ;;  %s176_s27 = scalar_lea.hbm %s294_s1, 128 }
  0x14   :  { %s27_s24 = sshll.u32 %s229_s23, 4  ;;  %p177_p8 = scmp.ne.s32.totalorder %s294_s1, %s176_s27  ;;  %s28_s24 = int_to_ptr.vmem [resolvable:$true] %s27_s24 }
  0x15   :  { %p180_p9 = scmp.lt.u32.totalorder %s176_s27, %s294_s1 }
  0x17   :  { %p182_p10 = pnand %p180_p9, %p177_p8 }
  0x19   :  { %185 = shalt.err (!%p182_p10)
}
  0x1a   :  { %s186_s4 = scalar_lea.vmem %s28_s24, 128  ;;  %p191_p12 = scmp.lt.s32.totalorder %s28_s24, %s28_s24 }
  0x1b   :  { %p187_p11 = scmp.ne.s32.totalorder %s28_s24, %s186_s4  ;;  %p192_p13 = scmp.lt.s32.totalorder %s186_s4, %s186_s4 }
  0x1d   :  { %p193_p0 = por %p192_p13, %p191_p12 }
  0x1f   :  { %p194_p1 = pnand %p193_p0, %p187_p11 }
  0x21   :  { %197 = shalt.err (!%p194_p1)
}
  0x22   :  { %33 = dma.hbm_to_vmem [thread:$0]  %s294_s1, 128, %s28_s24, [#allocation6], %s227_s19, %s227_s19, %s228_s20  }
  0x23   :  { %220 = dma.done.wait [#allocation3], 128  }
  0x24   :  { %221 = vsyncadd [#allocation3], 4294967168 }
  0x25   :  { %222 = dma.done.wait [#allocation6], 128  }
  0x26   :  { %223 = vsyncadd [#allocation6], 4294967168  ;;  %v230_v0 = vmov 0.0   ;;  %vm231_vm0 = vmmov 0   ;;  %v152_v1 = vld [vmem:[#allocation5] sm:$0xff]   ;;  %v153_v2 = vld [vmem:[#allocation2] sm:$0xff]  }
  0x27   :  { %139 = vmatprep.subr.bf16.mxu0 %v230_v0  ;;  %141 = vmatprep.mubr.msk.bf16.mxu0 %vm231_vm0, %v230_v0  ;;  %vm56_vm1 = vcmask 130048   ;;  %vm109_vm2 = vcmask 257024   ;;  %s232_s6 = smov [#allocation7]  }
  0x28   :  { %140 = vmatpush3.bf16.msra.mxu0 %v152_v1  ;;  %s117_s7 = sshll.u32 %s232_s6, 4  ;;  %s118_s7 = int_to_ptr.vmem [resolvable:$true] %s117_s7 }
  0x29   :  { %s198_s1 = scalar_lea.vmem %s118_s7, 128  ;;  %p203_p3 = scmp.lt.s32.totalorder %s118_s7, %s118_s7 }
  0x2a   :  { %p199_p2 = scmp.ne.s32.totalorder %s118_s7, %s198_s1  ;;  %p204_p4 = scmp.lt.s32.totalorder %s198_s1, %s198_s1 }
  0x2b   :  { %142 = vmatmul.mubr.msk.bf16.vlgmr.msra.gmra.mrb[0].mxu0 %vm56_vm1, %v153_v2 }
  0x2c   :  { %p205_p5 = por %p204_p4, %p203_p3 }
  0x2e   :  { %p206_p6 = pnand %p205_p5, %p199_p2 }
  0xfe   :  { %v94_v3 = vpop.f32.mrb[0].mxu0 }
  0xff   :  { %v135_v4 = vpack.c.bf16 %v94_v3, %v94_v3  ;;  %v143_v5 = vpop.f32.mrb[1].mxu0 }
 0x100   :  { %v97_v6 = vpop.f32.mrb[2].mxu0 }
 0x101   :  { %v136_v7 = vpack.c.bf16 %v97_v6, %v97_v6  ;;  %v144_v8 = vpop.f32.mrb[3].mxu0  ;;  %110 = vst.msk [vmem:[#allocation7] sm:$0xf] %vm109_vm2, %v135_v4 }
 0x103   :  { %111 = vst.msk [vmem:[#allocation7 + $0x4] sm:$0xf] %vm109_vm2, %v136_v7 }
 0x104   :  { %209 = shalt.err (!%p206_p6)
}
 0x105   :  { %s210_s10 = scalar_lea.hbm %s295_s2, 128 }
 0x106   :  { %p211_p7 = scmp.ne.s32.totalorder %s295_s2, %s210_s10  ;;  %p214_p8 = scmp.lt.u32.totalorder %s210_s10, %s295_s2 }
 0x108   :  { %p216_p9 = pnand %p214_p8, %p211_p7 }
 0x10a   :  { %219 = shalt.err (!%p216_p9)
}
 0x10b   :  { %123 = dma.vmem_to_hbm [thread:$0]  %s118_s7, 128, %s295_s2, [#allocation4], %s227_s19, %s227_s19, %s228_s20  }
 0x10c   :  { %224 = dma.done.wait [#allocation4], 128  }
 0x10d   :  { %225 = vsyncadd [#allocation4], 4294967168 }
 0x10e   :  { %127 = vsyncpa [#allocation3], 1 }
 0x10f   :  { %128 = vsyncpa [#allocation6], 1 }
 0x110   :  { %129 = vsyncpa [#allocation4], 1 }

</bundles_post_ra>
